<compile_context>
chip_gen: v5e
topology: v5e:2x2
jax: 0.10.0
libtpu: 0.0.40
codegen_flags: <defaults>
</compile_context>

<pallas_src>
import functools

import jax
import jax.numpy as jnp
from jax import lax
from jax.experimental import pallas as pl
from jax.experimental.pallas import tpu as pltpu

_BN_EPS = 1e-5


def _contract(w, x):
    """w: [M, K] (small), x: [K, HW] lane-dense  ->  [M, HW] float32.

    For tiny channel counts the MXU would run at <1% utilization, so the
    contraction is K broadcast multiply-accumulates on the VPU; larger K goes
    to the MXU.
    """
    _, k = w.shape
    if k <= 32:
        acc = w[:, 0:1] * x[0:1, :]
        for i in range(1, k):
            acc = acc + w[:, i:i + 1] * x[i:i + 1, :]
        return acc
    return jnp.dot(w, x, preferred_element_type=jnp.float32)


def _conv3x3_same(a, w_ref, bias, H, W):
    """3x3 'same' cross-correlation on a flattened [Cin, H*W] image.

    a:     [Cin, H*W] activations (spatial axis lane-dense).
    w_ref: Ref of shape [9, Cout, Cin], tap-major (t = ky*3 + kx).
    bias:  [Cout, 1].
    Spatial shifts = static lane rolls + border masks (zero padding).
    """
    HW = H * W
    flat = lax.broadcasted_iota(jnp.int32, (1, HW), 1)
    h_idx = flat // W
    w_idx = flat - h_idx * W

    acc = jnp.zeros((w_ref.shape[1], HW), jnp.float32) + bias
    for ky in range(3):
        for kx in range(3):
            t = ky * 3 + kx
            oy, ox = ky - 1, kx - 1
            if oy == 0 and ox == 0:
                tap = a
            else:
                shifted = jnp.roll(a, -(oy * W + ox), axis=1)
                valid = ((h_idx + oy >= 0) & (h_idx + oy < H) &
                         (w_idx + ox >= 0) & (w_idx + ox < W))
                tap = jnp.where(valid, shifted, 0.0)
            acc = acc + _contract(w_ref[t].astype(jnp.float32), tap)
    return acc


# --- Stage 1: 1x1 conv + per-image partial BN sums ---------------------------
def _conv1x1_stats_kernel(x_ref, w_ref, b_ref, y_ref, s1_ref, s2_ref):
    # x_ref: [1, Cin, HW]; w_ref: [Cout, Cin]; b_ref: [Cout, 1]
    x = x_ref[0].astype(jnp.float32)
    y = _contract(w_ref[...].astype(jnp.float32), x) + b_ref[...]
    y_ref[0] = y.astype(y_ref.dtype)
    s1_ref[0] = jnp.sum(y, axis=1, keepdims=True)       # [Cout, 1]
    s2_ref[0] = jnp.sum(y * y, axis=1, keepdims=True)   # [Cout, 1]


# --- Stage 2: folded BN + ReLU + 3x3 conv + partial BN sums of output --------
def _bn_relu_conv3x3_stats_kernel(x_ref, sc_ref, sh_ref, w_ref, b_ref,
                                  y_ref, s1_ref, s2_ref, *, H, W):
    a = x_ref[0].astype(jnp.float32)
    a = jnp.maximum(a * sc_ref[...] + sh_ref[...], 0.0)   # folded BN + ReLU
    y = _conv3x3_same(a, w_ref, b_ref[...], H, W)
    y_ref[0] = y.astype(y_ref.dtype)
    s1_ref[0] = jnp.sum(y, axis=1, keepdims=True)
    s2_ref[0] = jnp.sum(y * y, axis=1, keepdims=True)


# --- Stage 3: folded BN + ReLU + 3x3 conv + residual add ---------------------
def _bn_relu_conv3x3_res_kernel(x_ref, idn_ref, sc_ref, sh_ref, w_ref, b_ref,
                                y_ref, *, H, W):
    a = x_ref[0].astype(jnp.float32)
    a = jnp.maximum(a * sc_ref[...] + sh_ref[...], 0.0)
    y = _conv3x3_same(a, w_ref, b_ref[...], H, W)
    y_ref[0] = (y + idn_ref[0].astype(jnp.float32)).astype(y_ref.dtype)


def _fold_bn(s1, s2, count, gamma, beta):
    mean = s1 / count
    var = s2 / count - mean * mean              # biased (training-mode) variance
    scale = gamma * lax.rsqrt(var + _BN_EPS)
    shift = beta - mean * scale
    return scale, shift


def inconv_forward(x_nchw, params):
    (w1, b1, g0, be0, w3_0, b3_0, g1, be1, w3_1, b3_1) = params
    N, Cin, H, W = x_nchw.shape
    Cout = w1.shape[0]
    Cmid = w3_0.shape[0]
    HW = H * W
    count = jnp.float32(N * HW)

    x3 = x_nchw.reshape(N, Cin, HW)                       # free (no transpose)

    # Tiny parameter reshapes (done once in XLA).
    w1_2d = w1.reshape(Cout, Cin).astype(jnp.float32)
    b1_c = b1.reshape(Cout, 1).astype(jnp.float32)
    w0_t = jnp.transpose(w3_0, (2, 3, 0, 1)).reshape(9, Cmid, Cout).astype(jnp.float32)
    b0_c = b3_0.reshape(Cmid, 1).astype(jnp.float32)
    w1_t = jnp.transpose(w3_1, (2, 3, 0, 1)).reshape(9, Cout, Cmid).astype(jnp.float32)
    b1_c3 = b3_1.reshape(Cout, 1).astype(jnp.float32)

    parallel = pltpu.CompilerParams(dimension_semantics=("parallel",))

    def img_spec(c):
        return pl.BlockSpec((1, c, HW), lambda n: (n, 0, 0))

    def full_spec(shape):
        return pl.BlockSpec(shape, lambda n: (0,) * len(shape))

    def stat_spec(c):
        return pl.BlockSpec((1, c, 1), lambda n: (n, 0, 0))

    # ---------------- Stage 1: 1x1 conv + BN0 partial sums -------------------
    y0, s1a, s2a = pl.pallas_call(
        _conv1x1_stats_kernel,
        grid=(N,),
        in_specs=[img_spec(Cin), full_spec((Cout, Cin)), full_spec((Cout, 1))],
        out_specs=(img_spec(Cout), stat_spec(Cout), stat_spec(Cout)),
        out_shape=(jax.ShapeDtypeStruct((N, Cout, HW), jnp.float32),
                   jax.ShapeDtypeStruct((N, Cout, 1), jnp.float32),
                   jax.ShapeDtypeStruct((N, Cout, 1), jnp.float32)),
        compiler_params=parallel,
        cost_estimate=pl.CostEstimate(
            flops=2 * N * HW * Cin * Cout, transcendentals=0,
            bytes_accessed=4 * N * HW * (Cin + Cout)),
    )(x3, w1_2d, b1_c)

    scale0, shift0 = _fold_bn(jnp.sum(s1a, axis=0), jnp.sum(s2a, axis=0), count,
                              g0.reshape(Cout, 1).astype(jnp.float32),
                              be0.reshape(Cout, 1).astype(jnp.float32))

    # ---------------- Stage 2: BN0+ReLU+conv_0 + BN1 partial sums ------------
    t1, s1b, s2b = pl.pallas_call(
        functools.partial(_bn_relu_conv3x3_stats_kernel, H=H, W=W),
        grid=(N,),
        in_specs=[img_spec(Cout), full_spec((Cout, 1)), full_spec((Cout, 1)),
                  full_spec((9, Cmid, Cout)), full_spec((Cmid, 1))],
        out_specs=(img_spec(Cmid), stat_spec(Cmid), stat_spec(Cmid)),
        out_shape=(jax.ShapeDtypeStruct((N, Cmid, HW), jnp.float32),
                   jax.ShapeDtypeStruct((N, Cmid, 1), jnp.float32),
                   jax.ShapeDtypeStruct((N, Cmid, 1), jnp.float32)),
        compiler_params=parallel,
        cost_estimate=pl.CostEstimate(
            flops=2 * N * HW * 9 * Cout * Cmid, transcendentals=0,
            bytes_accessed=4 * N * HW * (Cout + Cmid)),
    )(y0, scale0, shift0, w0_t, b0_c)

    scale1, shift1 = _fold_bn(jnp.sum(s1b, axis=0), jnp.sum(s2b, axis=0), count,
                              g1.reshape(Cmid, 1).astype(jnp.float32),
                              be1.reshape(Cmid, 1).astype(jnp.float32))

    # ---------------- Stage 3: BN1+ReLU+conv_1 + residual --------------------
    out3 = pl.pallas_call(
        functools.partial(_bn_relu_conv3x3_res_kernel, H=H, W=W),
        grid=(N,),
        in_specs=[img_spec(Cmid), img_spec(Cout), full_spec((Cmid, 1)),
                  full_spec((Cmid, 1)), full_spec((9, Cout, Cmid)),
                  full_spec((Cout, 1))],
        out_specs=img_spec(Cout),
        out_shape=jax.ShapeDtypeStruct((N, Cout, HW), jnp.float32),
        compiler_params=parallel,
        cost_estimate=pl.CostEstimate(
            flops=2 * N * HW * 9 * Cmid * Cout, transcendentals=0,
            bytes_accessed=4 * N * HW * (Cmid + 2 * Cout)),
    )(t1, y0, scale1, shift1, w1_t, b1_c3)

    return out3.reshape(N, Cout, H, W)


# --------------------------- pure-JAX reference ------------------------------
def _reference(x, params):
    (w1, b1, g0, be0, w3_0, b3_0, g1, be1, w3_1, b3_1) = params

    def bn_train(z, gamma, beta):
        mean = jnp.mean(z, axis=(0, 2, 3), keepdims=True)
        var = jnp.mean((z - mean) ** 2, axis=(0, 2, 3), keepdims=True)
        zn = (z - mean) * lax.rsqrt(var + _BN_EPS)
        return zn * gamma.reshape(1, -1, 1, 1) + beta.reshape(1, -1, 1, 1)

    def conv3x3(z, w, b):
        y = lax.conv_general_dilated(
            z, w, window_strides=(1, 1), padding=((1, 1), (1, 1)),
            dimension_numbers=("NCHW", "OIHW", "NCHW"))
        return y + b.reshape(1, -1, 1, 1)

    y0 = jnp.einsum("nchw,oc->nohw", x, w1) + b1.reshape(1, -1, 1, 1)
    h0 = jax.nn.relu(bn_train(y0, g0, be0))
    t1 = conv3x3(h0, w3_0, b3_0)
    h1 = jax.nn.relu(bn_train(t1, g1, be1))
    t2 = conv3x3(h1, w3_1, b3_1)
    return t2 + y0


if __name__ == "__main__":
    key = jax.random.PRNGKey(0)
    keys = jax.random.split(key, 8)

    N, Cin, H, W = 2, 4, 16, 16
    Cout = 4              # ResBlock channels; mid_channels = out_channels
    Cmid = Cout

    x = jax.random.normal(keys[0], (N, Cin, H, W), dtype=jnp.float32)

    # PyTorch-default-style init: BN weight=1 / bias=0; conv uniform(+-1/sqrt(fan_in)).
    def uni(k, shape, fan_in):
        b = 1.0 / jnp.sqrt(jnp.float32(fan_in))
        return jax.random.uniform(k, shape, jnp.float32, -b, b)

    w1 = uni(keys[1], (Cout, Cin), Cin)                 # 1x1 conv weight [Cout, Cin]
    b1 = uni(keys[2], (Cout,), Cin)
    g0, be0 = jnp.ones((Cout,), jnp.float32), jnp.zeros((Cout,), jnp.float32)
    w3_0 = uni(keys[3], (Cmid, Cout, 3, 3), Cout * 9)   # conv_0 weight [Cmid, Cout, 3, 3]
    b3_0 = uni(keys[4], (Cmid,), Cout * 9)
    g1, be1 = jnp.ones((Cmid,), jnp.float32), jnp.zeros((Cmid,), jnp.float32)
    w3_1 = uni(keys[5], (Cout, Cmid, 3, 3), Cmid * 9)   # conv_1 weight [Cout, Cmid, 3, 3]
    b3_1 = uni(keys[6], (Cout,), Cmid * 9)

    params = (w1, b1, g0, be0, w3_0, b3_0, g1, be1, w3_1, b3_1)

    out = inconv_forward(x, params)
    out = jax.block_until_ready(out)

    ref = _reference(x, params)
    assert out.shape == (N, Cout, H, W)
    assert jnp.allclose(out, ref, atol=1e-3, rtol=1e-3), \
        float(jnp.max(jnp.abs(out - ref)))

    print("KERNEL_OK")
</pallas_src>

<mosaic_0001>
module attributes {stable_mosaic.version = 11 : i64} {
  func.func @_conv1x1_stats_kernel(%arg0: i32, %arg1: memref<1x4x256xf32, #tpu.memory_space<vmem>>, %arg2: memref<4x4xf32, #tpu.memory_space<vmem>>, %arg3: memref<4x1xf32, #tpu.memory_space<vmem>>, %arg4: memref<1x4x256xf32, #tpu.memory_space<vmem>>, %arg5: memref<1x4x1xf32, #tpu.memory_space<vmem>>, %arg6: memref<1x4x1xf32, #tpu.memory_space<vmem>>) attributes {dimension_semantics = [#tpu.dimension_semantics<parallel>], iteration_bounds = array<i64: 2>, scalar_prefetch = 0 : i64, scratch_operands = 0 : i64, tpu.core_type = #tpu.core_type<tc>, window_params = [{transform_indices = @transform_0, window_bounds = array<i64: 1, 4, 256>}, {pipeline_mode = #tpu.pipeline_mode<synchronous>, transform_indices = @transform_1, window_bounds = array<i64: 4, 4>}, {pipeline_mode = #tpu.pipeline_mode<synchronous>, transform_indices = @transform_2, window_bounds = array<i64: 4, 1>}, {transform_indices = @transform_3, window_bounds = array<i64: 1, 4, 256>}, {transform_indices = @transform_4, window_bounds = array<i64: 1, 4, 1>}, {transform_indices = @transform_5, window_bounds = array<i64: 1, 4, 1>}]} {
    %c0 = arith.constant 0 : index
    %c0_0 = arith.constant 0 : index
    %c0_1 = arith.constant 0 : index
    %0 = vector.load %arg1[%c0, %c0_0, %c0_1] : memref<1x4x256xf32, #tpu.memory_space<vmem>>, vector<1x4x256xf32>
    %1 = vector.shape_cast %0 : vector<1x4x256xf32> to vector<4x256xf32>
    %c0_2 = arith.constant 0 : index
    %c0_3 = arith.constant 0 : index
    %2 = vector.load %arg2[%c0_2, %c0_3] : memref<4x4xf32, #tpu.memory_space<vmem>>, vector<4x4xf32>
    %3 = vector.extract_strided_slice %2 {offsets = [0, 0], sizes = [4, 1], strides = [1, 1]} : vector<4x4xf32> to vector<4x1xf32>
    %4 = vector.extract_strided_slice %1 {offsets = [0, 0], sizes = [1, 256], strides = [1, 1]} : vector<4x256xf32> to vector<1x256xf32>
    %5 = vector.broadcast %3 : vector<4x1xf32> to vector<4x256xf32>
    %6 = vector.broadcast %4 : vector<1x256xf32> to vector<4x256xf32>
    %7 = arith.mulf %5, %6 : vector<4x256xf32>
    %8 = vector.extract_strided_slice %2 {offsets = [0, 1], sizes = [4, 1], strides = [1, 1]} : vector<4x4xf32> to vector<4x1xf32>
    %9 = vector.extract_strided_slice %1 {offsets = [1, 0], sizes = [1, 256], strides = [1, 1]} : vector<4x256xf32> to vector<1x256xf32>
    %10 = vector.broadcast %8 : vector<4x1xf32> to vector<4x256xf32>
    %11 = vector.broadcast %9 : vector<1x256xf32> to vector<4x256xf32>
    %12 = arith.mulf %10, %11 : vector<4x256xf32>
    %13 = arith.addf %7, %12 : vector<4x256xf32>
    %14 = vector.extract_strided_slice %2 {offsets = [0, 2], sizes = [4, 1], strides = [1, 1]} : vector<4x4xf32> to vector<4x1xf32>
    %15 = vector.extract_strided_slice %1 {offsets = [2, 0], sizes = [1, 256], strides = [1, 1]} : vector<4x256xf32> to vector<1x256xf32>
    %16 = vector.broadcast %14 : vector<4x1xf32> to vector<4x256xf32>
    %17 = vector.broadcast %15 : vector<1x256xf32> to vector<4x256xf32>
    %18 = arith.mulf %16, %17 : vector<4x256xf32>
    %19 = arith.addf %13, %18 : vector<4x256xf32>
    %20 = vector.extract_strided_slice %2 {offsets = [0, 3], sizes = [4, 1], strides = [1, 1]} : vector<4x4xf32> to vector<4x1xf32>
    %21 = vector.extract_strided_slice %1 {offsets = [3, 0], sizes = [1, 256], strides = [1, 1]} : vector<4x256xf32> to vector<1x256xf32>
    %22 = vector.broadcast %20 : vector<4x1xf32> to vector<4x256xf32>
    %23 = vector.broadcast %21 : vector<1x256xf32> to vector<4x256xf32>
    %24 = arith.mulf %22, %23 : vector<4x256xf32>
    %25 = arith.addf %19, %24 : vector<4x256xf32>
    %c0_4 = arith.constant 0 : index
    %c0_5 = arith.constant 0 : index
    %26 = vector.load %arg3[%c0_4, %c0_5] : memref<4x1xf32, #tpu.memory_space<vmem>>, vector<4x1xf32>
    %27 = vector.broadcast %26 : vector<4x1xf32> to vector<4x256xf32>
    %28 = arith.addf %25, %27 : vector<4x256xf32>
    %c0_6 = arith.constant 0 : index
    %c0_7 = arith.constant 0 : index
    %c0_8 = arith.constant 0 : index
    %29 = vector.load %arg4[%c0_6, %c0_7, %c0_8] : memref<1x4x256xf32, #tpu.memory_space<vmem>>, vector<1x4x256xf32>
    %30 = vector.shape_cast %29 : vector<1x4x256xf32> to vector<4x256xf32>
    %31 = vector.shape_cast %28 : vector<4x256xf32> to vector<1x4x256xf32>
    tpu.vector_store %arg4[%c0_6, %c0_7, %c0_8], %31 {strides = array<i32>} : memref<1x4x256xf32, #tpu.memory_space<vmem>>, vector<1x4x256xf32>,
    %cst = arith.constant dense<0.000000e+00> : vector<4xf32>
    %32 = vector.multi_reduction <add>, %28, %cst [1] : vector<4x256xf32> to vector<4xf32>
    %33 = vector.shape_cast %32 : vector<4xf32> to vector<4x1xf32>
    %c0_9 = arith.constant 0 : index
    %c0_10 = arith.constant 0 : index
    %c0_11 = arith.constant 0 : index
    %34 = vector.load %arg5[%c0_9, %c0_10, %c0_11] : memref<1x4x1xf32, #tpu.memory_space<vmem>>, vector<1x4x1xf32>
    %35 = vector.shape_cast %34 : vector<1x4x1xf32> to vector<4x1xf32>
    %36 = vector.shape_cast %33 : vector<4x1xf32> to vector<1x4x1xf32>
    tpu.vector_store %arg5[%c0_9, %c0_10, %c0_11], %36 {strides = array<i32>} : memref<1x4x1xf32, #tpu.memory_space<vmem>>, vector<1x4x1xf32>,
    %37 = arith.mulf %28, %28 : vector<4x256xf32>
    %cst_12 = arith.constant dense<0.000000e+00> : vector<4xf32>
    %38 = vector.multi_reduction <add>, %37, %cst_12 [1] : vector<4x256xf32> to vector<4xf32>
    %39 = vector.shape_cast %38 : vector<4xf32> to vector<4x1xf32>
    %c0_13 = arith.constant 0 : index
    %c0_14 = arith.constant 0 : index
    %c0_15 = arith.constant 0 : index
    %40 = vector.load %arg6[%c0_13, %c0_14, %c0_15] : memref<1x4x1xf32, #tpu.memory_space<vmem>>, vector<1x4x1xf32>
    %41 = vector.shape_cast %40 : vector<1x4x1xf32> to vector<4x1xf32>
    %42 = vector.shape_cast %39 : vector<4x1xf32> to vector<1x4x1xf32>
    tpu.vector_store %arg6[%c0_13, %c0_14, %c0_15], %42 {strides = array<i32>} : memref<1x4x1xf32, #tpu.memory_space<vmem>>, vector<1x4x1xf32>,
    return
  }
  func.func @transform_0(%arg0: i32) -> (i32, i32, i32) {
    %c0_i32 = arith.constant 0 : i32
    %c0_i32_0 = arith.constant 0 : i32
    %c0_i32_1 = arith.constant 0 : i32
    return %arg0, %c0_i32, %c0_i32_0 : i32, i32, i32
  }
  func.func @transform_1(%arg0: i32) -> (i32, i32) {
    %c0_i32 = arith.constant 0 : i32
    %c0_i32_0 = arith.constant 0 : i32
    %c0_i32_1 = arith.constant 0 : i32
    return %c0_i32, %c0_i32_0 : i32, i32
  }
  func.func @transform_2(%arg0: i32) -> (i32, i32) {
    %c0_i32 = arith.constant 0 : i32
    %c0_i32_0 = arith.constant 0 : i32
    %c0_i32_1 = arith.constant 0 : i32
    return %c0_i32, %c0_i32_0 : i32, i32
  }
  func.func @transform_3(%arg0: i32) -> (i32, i32, i32) {
    %c0_i32 = arith.constant 0 : i32
    %c0_i32_0 = arith.constant 0 : i32
    %c0_i32_1 = arith.constant 0 : i32
    return %arg0, %c0_i32, %c0_i32_0 : i32, i32, i32
  }
  func.func @transform_4(%arg0: i32) -> (i32, i32, i32) {
    %c0_i32 = arith.constant 0 : i32
    %c0_i32_0 = arith.constant 0 : i32
    %c0_i32_1 = arith.constant 0 : i32
    return %arg0, %c0_i32, %c0_i32_0 : i32, i32, i32
  }
  func.func @transform_5(%arg0: i32) -> (i32, i32, i32) {
    %c0_i32 = arith.constant 0 : i32
    %c0_i32_0 = arith.constant 0 : i32
    %c0_i32_1 = arith.constant 0 : i32
    return %arg0, %c0_i32, %c0_i32_0 : i32, i32, i32
  }
}

</mosaic_0001>

<bundles_post_ra>
// kernel: tpu_custom_call.1
= control target key start
LH: loop header
LB: loop body
LE: loop exit
PB: predicated region body
PF: predicated region fallthrough
CT: control target
= control target key end

     0   :  { %11 = vsyncpa [#allocation3], 0  ;;  %s857_s0 = inlined_call_operand.hbm [shape: f32[2,4,256], index: 0, kind: input, shape index: {}]   ;;  %s858_s1 = inlined_call_operand.vmem [shape: f32[4,4], index: 1, kind: input, shape index: {}]   ;;  %s859_s2 = inlined_call_operand.vmem [shape: f32[4,1], index: 2, kind: input, shape index: {}]   ;;  %s860_s3 = inlined_call_operand.hbm [shape: f32[2,4,256], index: 3, kind: output, shape index: {0}]   ;;  %s861_s4 = inlined_call_operand.vmem [shape: f32[2,4,1], index: 4, kind: output, shape index: {1}]   ;;  %s862_s5 = inlined_call_operand.vmem [shape: f32[2,4,1], index: 5, kind: output, shape index: {2}]  }
   0x1   :  { %13 = vsyncpa [#allocation3 + $0x1], 0 }
   0x2   :  { %14 = vsyncpa [#allocation4], 0 }
   0x3   :  { %16 = vsyncpa [#allocation4 + $0x1], 0  ;;  %s707_s18 = smov 0   ;;  %s709_s19 = smov 0  }
   0x4   :  { %s711_s20 = smov 0   ;;  %s713_s21 = smov 0  }
   0x5 LB: > { %s728_s22 = sadd.s32 4294967295, %s671_s21   ;;  %s501_s23 = sadd.s32 4294967294, %s671_s21   ;;  %s671_s21 = sphi %s713_s21, %s872_s21   ;;  %s667_s20 = sphi %s711_s20, %s871_s20   ;;  %s663_s19 = sphi %s709_s19, %s870_s19   ;;  %s659_s18 = sphi %s707_s18, %s869_s18  }
   0x6   : > { %s732_s24 = sadd.s32 1, %s671_s21   ;;  %s29_s25 = sadd.s32 1, %s667_s20 }
   0x7   : > { %s26_s26 = ssub.s32 %s671_s21, %s732_s24  ;;  %p36_p0 = scmp.ne.s32.totalorder %s667_s20, %s663_s19 }
   0x8   : > { %p27_p1 = scmp.eq.s32.totalorder %s26_s26, 0  ;;  %p37_p2 = scmp.eq.s32.totalorder %s671_s21, 0 }
   0x9   : > { %p42_p3 = scmp.ne.s32.totalorder %s663_s19, %s659_s18  ;;  %p43_p4 = scmp.eq.s32.totalorder %s728_s22, 0 }
   0xa   : > { %s744_s27 = scalar_select %p27_p1, %s667_s20, %s29_s25  }
   0xb   : > { %p746_p5 = por %p37_p2, %p36_p0  ;;  %p750_p6 = por %p43_p4, %p42_p3 }
   0xc   : > { %p108_p7 = scmp.eq.s32.totalorder %s728_s22, 1  ;;  %p114_p8 = scmp.eq.s32.totalorder %s501_s23, 1 }
   0xd   : > { %p531_p10 = scmp.lt.s32.totalorder %s671_s21, 2  ;;  %s192_s7 = sand.u32 1, %s667_s20  }
   0xe   : > { %p757_p11 = por %p108_p7, %p36_p0  ;;  %p761_p12 = por %p114_p8, %p42_p3 }
   0xf   : > { %s517_s8 = sshll.u32 %s671_s21, 3  ;;  %s504_s9 = sshll.u32 %s192_s7, 3 }
  0x10   : > { %s201_s12 = scalar_lea.hbm %s857_s0, %s517_s8  ;;  %s196_s14 = scalar_lea.vmem [#allocation2], %s504_s9 }
  0x11   : > { %s203_s13 = sshll.u32 %s201_s12, 4  ;;  %s205_s15 = sshll.u32 %s196_s14, 4  ;;  %s204_s13 = int_to_ptr.hbm [resolvable:$true] %s203_s13  ;;  %s206_s15 = int_to_ptr.vmem [resolvable:$true] %s205_s15 }
  0x12   : > { %p772_p13 = pnand %p531_p10, %p746_p5  ;;  %p507_p0 = scmp.ge.s32.totalorder %s671_s21, 1 }
  0x13   : > { %p210_p1 = scmp.lt.s32.totalorder %s671_s21, 3  ;;  %s193_s17 = scalar_lea.sflag [#allocation3], %s192_s7 }
  0x14   : > { %s575_s23 = sshra.s32 %s204_s13, 4  ;;  %p579_p3 = pneg %p772_p13  ;;  %s576_s23 = int_to_ptr.hbm [resolvable:$true] %s575_s23 }
  0x15   : > { %s577_s25 = scalar_lea.hbm %s576_s23, 8  ;;  %s582_s28 = scalar_lea.hbm %s857_s0, 16 }
  0x16   : > { %p578_p2 = scmp.ne.s32.totalorder %s576_s23, %s577_s25  ;;  %p583_p5 = scmp.lt.s32.totalorder %s576_s23, %s857_s0 }
  0x17   : > { %p584_p8 = scmp.lt.s32.totalorder %s582_s28, %s577_s25 }
  0x18   : > { %p580_p4 = pnand %p579_p3, %p578_p2 }
  0x19   : > { %p585_p10 = por %p584_p8, %p583_p5 }
  0x1a   : > { %p581_p7 = pneg %p580_p4 }
  0x1c   : > { %p586_p9 = pnand %p585_p10, %p581_p7 }
  0x1e   : > { %589 = shalt.err (!%p586_p9)
}
  0x1f   : > { %526 = dma.hbm_to_vmem [thread:$0]  (!%p772_p13), %s204_s13, 128, %s206_s15, %s193_s17  }
  0x20   : > { %p211_p2 = pnand %p507_p0, %p210_p1 }
  0x21   : > { %s793_s7 = sand.u32 (!%p211_p2), 1, %s663_s19  }
  0x22   : > { %214 = sbr.rel (%p211_p2) target bundleno = 299 (0x12b), region = 32  ;;  %s508_s11 = sshll.u32 (!%p211_p2), %s793_s7, 3 }
  0x23   : > { %s217_s12 = scalar_lea.sflag (!%p211_p2), [#allocation3], %s793_s7  ;;  %s220_s14 = scalar_lea.vmem (!%p211_p2), [#allocation2], %s508_s11 }
  0x27   : > { %650 = dma.done.wait (%p750_p6), %s217_s12, 128  }
  0x28   : > { %652 = vsyncadd (%p750_p6), %s217_s12, 4294967168  ;;  %v673_v0 = vmov 0   ;;  %v674_v1 = vmov 2   ;;  %v265_v2 = vld [vmem:[%s858_s1] sm:$0xf]  ;;  %v675_v4 = vmov 1  }
  0x29   : > { %569 = vset.pattern.permute.xlu0 %v673_v0  ;;  %571 = vset.pattern.permute.xlu1 %v674_v1  ;;  %v322_v3 = vld [vmem:[%s859_s2] sm:$0xf]  ;;  %v676_v5 = vmov 3   ;;  %s518_s29 = sshll.u32 %s728_s22, 3  ;;  %vm333_vm0 = vcmask 1043456   ;;  %s243_s8 = scalar_lea.vmem [#allocation5], %s508_s11 }
  0x2a   : > { %573 = vset.pattern.permute.xlu2 %v673_v0  ;;  %268 = vperm.xlu0 %569, %v265_v2   ;;  %v264_v6 = vld [vmem:[%s220_s14] sm:$0xff]  ;;  %s372_s26 = scalar_lea.hbm %s860_s3, %s518_s29  ;;  %s374_s28 = sshll.u32 %s243_s8, 4  ;;  %s375_s28 = int_to_ptr.vmem [resolvable:$true] %s374_s28 }
  0x2b   : > { %295 = vperm.xlu1 %571, %v265_v2   ;;  %325 = vperm.xlu2 %573, %v322_v3   ;;  %v272_v9 = vperm.slane %v264_v6, 0  ;;  %v273_v10 = vperm.slane %v264_v6, 4  ;;  %v284_v11 = vperm.slane %v264_v6, 1  ;;  %v285_v12 = vperm.slane %v264_v6, 5  ;;  %s376_s9 = sshll.u32 %s372_s26, 4  ;;  %s353_s10 = scalar_lea.sflag [#allocation4], %s793_s7  ;;  %s377_s9 = int_to_ptr.hbm [resolvable:$true] %s376_s9 }
  0x2c   : > { %v298_v13 = vperm.slane %v264_v6, 2  ;;  %v299_v14 = vperm.slane %v264_v6, 6  ;;  %v312_v15 = vperm.slane %v264_v6, 3  ;;  %v313_v16 = vperm.slane %v264_v6, 7  ;;  %s619_s11 = sshra.s32 %s377_s9, 4  ;;  %s625_s15 = scalar_lea.hbm %s860_s3, 16  ;;  %s620_s11 = int_to_ptr.hbm [resolvable:$true] %s619_s11 }
  0x2d   : > { %v276_v17 = vperm.slane %v272_v9, 0  ;;  %v277_v18 = vperm.slane %v273_v10, 0  ;;  %v288_v19 = vperm.slane %v284_v11, 1  ;;  %v289_v20 = vperm.slane %v285_v12, 1  ;;  %s621_s12 = scalar_lea.hbm %s620_s11, 8  ;;  %p626_p0 = scmp.lt.s32.totalorder %s620_s11, %s860_s3 }
  0x2e   : > { %v302_v21 = vperm.slane %v298_v13, 2  ;;  %v303_v22 = vperm.slane %v299_v14, 2  ;;  %v316_v23 = vperm.slane %v312_v15, 3  ;;  %v317_v24 = vperm.slane %v313_v16, 3  ;;  %p622_p6 = scmp.ne.s32.totalorder %s620_s11, %s621_s12  ;;  %p627_p1 = scmp.lt.s32.totalorder %s625_s15, %s621_s12 }
  0x30   : > { %p623_p9 = pnand %p622_p6, %p757_p11  ;;  %p628_p3 = por %p627_p1, %p626_p0 }
  0x32   : > { %570 = vset.pattern.permute.xlu0 %v675_v4  ;;  %p624_p13 = pneg %p623_p9 }
  0x33   : > { %572 = vset.pattern.permute.xlu1 %v676_v5  ;;  %281 = vperm.xlu0 %570, %v265_v2  }
  0x34   : > { %309 = vperm.xlu1 %572, %v265_v2   ;;  %p629_p4 = pnand %p628_p3, %p624_p13 }
  0x3b   : > { %574 = vset.pattern.permute.xlu0 %v673_v0 }
  0x85   : > { %v326_v39 = vpop.permute.xlu2 %325 }
  0x9c   : > { %v269_v7 = vpop.permute.xlu0 %268 }
  0x9d   : > { %v296_v8 = vpop.permute.xlu1 %295  ;;  %v278_v27 = vmul.f32 %v276_v17, %v269_v7  ;;  %v279_v28 = vmul.f32 %v277_v18, %v269_v7 }
  0x9e   : > { %v304_v31 = vmul.f32 %v302_v21, %v296_v8  ;;  %v305_v32 = vmul.f32 %v303_v22, %v296_v8 }
  0xa5   : > { %v282_v25 = vpop.permute.xlu0 %281 }
  0xa6   : > { %v310_v26 = vpop.permute.xlu1 %309  ;;  %v290_v29 = vmul.f32 %v288_v19, %v282_v25  ;;  %v291_v30 = vmul.f32 %v289_v20, %v282_v25 }
  0xa7   : > { %v318_v35 = vmul.f32 %v316_v23, %v310_v26  ;;  %v319_v36 = vmul.f32 %v317_v24, %v310_v26 }
  0xa8   : > { %v292_v33 = vadd.f32 %v290_v29, %v278_v27  ;;  %v293_v34 = vadd.f32 %v291_v30, %v279_v28 }
  0xaa   : > { %v306_v37 = vadd.f32 %v304_v31, %v292_v33  ;;  %v307_v38 = vadd.f32 %v305_v32, %v293_v34 }
  0xac   : > { %v320_v40 = vadd.f32 %v318_v35, %v306_v37  ;;  %v321_v41 = vadd.f32 %v319_v36, %v307_v38 }
  0xae   : > { %v328_v42 = vadd.f32 %v326_v39, %v320_v40  ;;  %v329_v43 = vadd.f32 %v326_v39, %v321_v41 }
  0xb0   : > { %v332_v44 = vrot.slane %v329_v43, 4  ;;  %v337_v45 = vsel %vm333_vm0, %v328_v42, 0.0  ;;  %v338_v46 = vsel %vm333_vm0, %v329_v43, 0.0  ;;  %v344_v47 = vmul.f32 %v328_v42, %v328_v42 }
  0xb1   : > { %v339_v48 = vadd.f32 %v338_v46, %v337_v45  ;;  %v345_v49 = vmul.f32 %v329_v43, %v329_v43 }
  0xb2   : > { %v334_v50 = vsel %vm333_vm0, %v328_v42, %v332_v44  ;;  %v346_v51 = vsel %vm333_vm0, %v344_v47, 0.0 }
  0xb3   : > { %340 = vadd.xlane.f32.xlu2 %v339_v48  ;;  %v347_v52 = vsel %vm333_vm0, %v345_v49, 0.0  ;;  %336 = vst [vmem:[%s243_s8] sm:$0xff] %v334_v50 }
  0xb4   : > { %v348_v53 = vadd.f32 %v347_v52, %v346_v51 }
  0xb5   : > { %632 = shalt.err (!%p629_p4)
}
  0xb6   : > { %521 = dma.vmem_to_hbm [thread:$0]  (%p757_p11), %s375_s28, 128, %s377_s9, %s353_s10   ;;  %349 = vadd.xlane.f32.xlu1 %v348_v53  ;;  %vm342_vm1 = vcmask 3072  }
  0xb7   : > { %p256_p7 = scmp.lt.s32.totalorder %s728_s22, 1 }
  0xb9   : > { %s874_s22 = smov (!%p256_p7, %s728_s22), 1 }
  0xba   : > { %s510_s7 = sshll.u32 %s874_s22, 2 }
  0xbb   : > { %s259_s25 = scalar_lea.vmem %s861_s4, %s510_s7  ;;  %s263_s11 = scalar_lea.vmem %s862_s5, %s510_s7 }
 0x126   : > { %v341_v54 = vpop.xlane.xlu2 %340 }
 0x127   : > { %343 = vst.msk [vmem:[%s259_s25] sm:$0xf] %vm342_vm1, %v341_v54 }
 0x129   : > { %v350_v55 = vpop.xlane.xlu1 %349 }
 0x12a   : > { %351 = vst.msk [vmem:[%s263_s11] sm:$0xf] %vm342_vm1, %v350_v55 }
 0x12b PF: > { %s394_s30 = sand.u32 1, %s659_s18   ;;  %p868_p11 = scmp.ge.s32.totalorder %s671_s21, 2 }
 0x12c   : > { %s395_s22 = scalar_lea.sflag [#allocation4], %s394_s30 }
 0x12d   : > { %p528_p5 = pnand %p868_p11, %p761_p12 }
 0x12f   : > { %p529_p8 = pneg %p528_p5 }
 0x131   : > { %654 = dma.done.wait (%p529_p8), %s395_s22, 128  }
 0x132   : > { %656 = vsyncadd (%p529_p8), %s395_s22, 4294967168  ;;  %p19_p10 = scmp.ge.s32.totalorder %s732_s24, 4   ;;  %s869_s18 = smov %s663_s19 }
 0x133   : > { %s870_s19 = smov %s667_s20  ;;  %s871_s20 = smov %s744_s27 }
 0x134   : > { %s872_s21 = smov %s732_s24  ;;  %21 = sbr.rel (!%p19_p10) target bundleno = 5 (0x5), region = 101 }
 0x139   :  { %415 = vsyncpa [#allocation3], 1 }
 0x13a   :  { %417 = vsyncpa [#allocation3 + $0x1], 1 }
 0x13b   :  { %418 = vsyncpa [#allocation4], 1 }
 0x13c   :  { %420 = vsyncpa [#allocation4 + $0x1], 1 }

</bundles_post_ra>
